<compile_context>
chip_gen: v7x
topology: tpu7x:2x2x1
jax: 0.10.0
libtpu: 0.0.40
codegen_flags: <defaults>
</compile_context>

<pallas_src>
import jax
import jax.numpy as jnp
from jax.experimental import pallas as pl
from jax.experimental.pallas import tpu as pltpu


def _round_up(n, m):
    return ((n + m - 1) // m) * m


def cbow_kernel(x_ref, w1_ref, w2_ref, b2_ref, o_ref, h_ref):
    """Grid = (i: batch tiles [parallel], j: output-vocab tiles [sequential]).

    x_ref : (tb, Vp)  input rows for batch tile i (full input-vocab width)
    w1_ref: (Vp, Ep)  W1 in (in, out) layout, fully resident in VMEM
    w2_ref: (Ep, tn)  W2 in (in, out) layout, output-vocab tile j (streamed)
    b2_ref: (1,  tn)  f32 effective bias (b1 @ W2.T + b2) slice for tile j
    o_ref : (tb, tn)  output tile
    h_ref : (tb, Ep)  VMEM scratch caching the hidden layer for batch tile i
    """
    # Layer 1 runs once per batch tile: j is the innermost, sequential axis,
    # so the cached hidden activations are valid for every subsequent j.
    @pl.when(pl.program_id(1) == 0)
    def _layer1():
        h = jnp.dot(x_ref[...], w1_ref[...], preferred_element_type=jnp.float32)
        h_ref[...] = h.astype(h_ref.dtype)

    # Layer 2: (tb, Ep) @ (Ep, tn) with f32 accumulation; bias in the epilogue.
    out = jnp.dot(h_ref[...], w2_ref[...], preferred_element_type=jnp.float32)
    o_ref[...] = (out + b2_ref[...]).astype(o_ref.dtype)


def prep_cbow_params(w1, b1, w2, b2, compute_dtype=jnp.bfloat16):
    """One-time conversion of PyTorch nn.Linear parameters.

    w1: (E, V), b1: (E,), w2: (V, E), b2: (V,)   (PyTorch nn.Linear layout)

    Returns (in, out)-layout weights, zero-padded to multiples of 128 and cast
    to `compute_dtype`, plus one f32 effective output bias
        b2_eff = b1 @ w2.T + b2
    (exact fold — there is no nonlinearity between the two layers).  All
    transposes / pads / casts happen here exactly once, never per forward.
    """
    E, V = w1.shape
    Vp, Ep = _round_up(V, 128), _round_up(E, 128)
    w1_io = jnp.pad(w1.T, ((0, Vp - V), (0, Ep - E))).astype(compute_dtype)  # (Vp, Ep)
    w2_io = jnp.pad(w2.T, ((0, Ep - E), (0, Vp - V))).astype(compute_dtype)  # (Ep, Vp)
    b2_eff = (b1.astype(jnp.float32) @ w2.T.astype(jnp.float32)
              + b2.astype(jnp.float32))                                      # (V,) f32
    b2_row = jnp.pad(b2_eff, (0, Vp - V)).reshape(1, Vp)
    return {"w1": w1_io, "w2": w2_io, "b2": b2_row, "V": V, "E": E}


def cbow_forward(x, params, *, tb=None, tn=None, out_dtype=jnp.float32):
    """x: (B, V) float. Returns (B, V) `out_dtype` = CBOW forward pass."""
    w1p, w2p, b2p = params["w1"], params["w2"], params["b2"]
    V = params["V"]
    Vp, Ep = w1p.shape
    B, Vin = x.shape
    assert Vin == V, "input feature dim must equal vocab_size"

    cdt = w1p.dtype
    # Tile sizes: lane-dense output tiles (tn multiple of 128); tb as large as
    # the batch allows (up to 512) so W2 streaming is amortized per batch tile.
    if tb is None:
        tb = min(512, _round_up(B, 8))
    if tn is None:
        tn = 512 if Vp % 512 == 0 else (256 if Vp % 256 == 0 else 128)
    Bp = _round_up(B, tb)

    xp = x
    if (Bp, Vp) != (B, V):
        xp = jnp.pad(x, ((0, Bp - B), (0, Vp - V)))
    xp = xp.astype(cdt)

    grid = (Bp // tb, Vp // tn)

    # VMEM budget: double-buffered blocks + scratch + margin, clamped to the
    # v7x 64 MiB physical VMEM per TensorCore (v5e/v6e have 128 MiB physical,
    # but their 16/32 MiB scoped defaults are too small for realistic V).
    itm = jnp.dtype(cdt).itemsize
    vmem_need = (2 * tb * Vp * itm                                # x block
                 + 2 * Vp * Ep * itm                              # W1 (resident)
                 + 2 * Ep * tn * itm                              # W2 tile
                 + 2 * tn * 4                                     # b2 tile
                 + 2 * tb * tn * jnp.dtype(out_dtype).itemsize    # out tile
                 + tb * Ep * itm                                  # h scratch
                 + (2 << 20))                                     # margin
    vmem_limit = int(min(max(vmem_need, 16 << 20), 64 << 20))

    out = pl.pallas_call(
        cbow_kernel,
        out_shape=jax.ShapeDtypeStruct((Bp, Vp), out_dtype),
        grid=grid,
        in_specs=[
            pl.BlockSpec((tb, Vp), lambda i, j: (i, 0)),   # x rows (per batch tile)
            pl.BlockSpec((Vp, Ep), lambda i, j: (0, 0)),   # W1, resident (constant map)
            pl.BlockSpec((Ep, tn), lambda i, j: (0, j)),   # W2, streamed per j
            pl.BlockSpec((1, tn), lambda i, j: (0, j)),    # b2_eff slice
        ],
        out_specs=pl.BlockSpec((tb, tn), lambda i, j: (i, j)),
        scratch_shapes=[pltpu.VMEM((tb, Ep), cdt)],        # cached hidden layer
        compiler_params=pltpu.CompilerParams(
            # j must stay sequential ("arbitrary"): layer 1 is computed only at
            # j == 0 and the h scratch is reused across all j of a batch tile.
            # i is "parallel" for v7x TensorCore sharding (collapses to 1 tile
            # when B <= tb, which is harmless on 1-TC v5e/v6e).
            dimension_semantics=("parallel", "arbitrary"),
            vmem_limit_bytes=vmem_limit),
    )(xp, w1p, w2p, b2p)

    if (Bp, Vp) != (B, V):
        out = out[:B, :V]
    return out


if __name__ == "__main__":
    # Vocab from the reference script: 8 unique words.
    text = 'the quick brown fox jumps over the lazy dog'.split()
    vocab_size = len(set(text))          # 8
    embedding_dim = 32
    batch = 8

    key = jax.random.PRNGKey(0)
    kx, kw1, kb1, kw2, kb2 = jax.random.split(key, 5)

    # Deterministic synthetic params in PyTorch nn.Linear shapes.
    bound1 = 1.0 / (vocab_size ** 0.5)
    bound2 = 1.0 / (embedding_dim ** 0.5)
    w1 = jax.random.uniform(kw1, (embedding_dim, vocab_size), jnp.float32,
                            -bound1, bound1)
    b1 = jax.random.uniform(kb1, (embedding_dim,), jnp.float32, -bound1, bound1)
    w2 = jax.random.uniform(kw2, (vocab_size, embedding_dim), jnp.float32,
                            -bound2, bound2)
    b2 = jax.random.uniform(kb2, (vocab_size,), jnp.float32, -bound2, bound2)

    # Bag-of-words style multi-hot/context input.
    x = jax.random.uniform(kx, (batch, vocab_size), jnp.float32)

    # Pure-JAX reference (same math as the PyTorch forward).
    ref = (x @ w1.T + b1) @ w2.T + b2

    # --- f32 path: strict correctness check -------------------------------
    params_f32 = prep_cbow_params(w1, b1, w2, b2, compute_dtype=jnp.float32)
    out_f32 = jax.block_until_ready(cbow_forward(x, params_f32))
    assert out_f32.shape == (batch, vocab_size)
    assert jnp.allclose(out_f32, ref, atol=1e-5, rtol=1e-5)

    # --- bf16 default path (f32 accumulate + f32 bias epilogue) ------------
    params_bf16 = prep_cbow_params(w1, b1, w2, b2)          # bf16 by default
    out_bf16 = jax.block_until_ready(cbow_forward(x, params_bf16))
    assert out_bf16.shape == (batch, vocab_size)
    assert jnp.allclose(out_bf16, ref, atol=5e-2, rtol=5e-2)

    print("KERNEL_OK")
</pallas_src>

<mosaic_0001>
module attributes {stable_mosaic.version = 11 : i64} {
  func.func @cbow_kernel(%arg0: i32, %arg1: i32, %arg2: memref<8x128xf32, #tpu.memory_space<vmem>>, %arg3: memref<128x128xf32, #tpu.memory_space<vmem>>, %arg4: memref<128x128xf32, #tpu.memory_space<vmem>>, %arg5: memref<1x128xf32, #tpu.memory_space<vmem>>, %arg6: memref<8x128xf32, #tpu.memory_space<vmem>>, %arg7: memref<8x128xf32, #tpu.memory_space<vmem>>) attributes {dimension_semantics = [#tpu.dimension_semantics<parallel>, #tpu.dimension_semantics<arbitrary>], iteration_bounds = array<i64: 1, 1>, scalar_prefetch = 0 : i64, scratch_operands = 1 : i64, tpu.core_type = #tpu.core_type<tc>, window_params = [{transform_indices = @transform_0, window_bounds = array<i64: 8, 128>}, {pipeline_mode = #tpu.pipeline_mode<synchronous>, transform_indices = @transform_1, window_bounds = array<i64: 128, 128>}, {transform_indices = @transform_2, window_bounds = array<i64: 128, 128>}, {transform_indices = @transform_3, window_bounds = array<i64: 1, 128>}, {transform_indices = @transform_4, window_bounds = array<i64: 8, 128>}]} {
    %c0_i32 = arith.constant 0 : i32
    %0 = arith.cmpi eq, %arg1, %c0_i32 : i32
    %1 = arith.extui %0 : i1 to i32
    %c0_i32_0 = arith.constant 0 : i32
    %2 = arith.cmpi ne, %1, %c0_i32_0 : i32
    scf.if %2 {
      %c0_8 = arith.constant 0 : index
      %c0_9 = arith.constant 0 : index
      %10 = vector.load %arg2[%c0_8, %c0_9] : memref<8x128xf32, #tpu.memory_space<vmem>>, vector<8x128xf32>
      %c0_10 = arith.constant 0 : index
      %c0_11 = arith.constant 0 : index
      %11 = vector.load %arg3[%c0_10, %c0_11] : memref<128x128xf32, #tpu.memory_space<vmem>>, vector<128x128xf32>
      %cst_12 = arith.constant dense<0.000000e+00> : vector<8x128xf32>
      %12 = tpu.matmul %10, %11, %cst_12 {dimension_numbers = #tpu.dot_dimension_numbers<[1], [0], [0], [1], [0, 0, 1, 1], [], []>} : vector<8x128xf32>, vector<128x128xf32>, vector<8x128xf32> -> vector<8x128xf32>
      %c0_13 = arith.constant 0 : index
      %c0_14 = arith.constant 0 : index
      %13 = vector.load %arg7[%c0_13, %c0_14] : memref<8x128xf32, #tpu.memory_space<vmem>>, vector<8x128xf32>
      tpu.vector_store %arg7[%c0_13, %c0_14], %12 {strides = array<i32>} : memref<8x128xf32, #tpu.memory_space<vmem>>, vector<8x128xf32>,
    } else {
    }
    %c0 = arith.constant 0 : index
    %c0_1 = arith.constant 0 : index
    %3 = vector.load %arg7[%c0, %c0_1] : memref<8x128xf32, #tpu.memory_space<vmem>>, vector<8x128xf32>
    %c0_2 = arith.constant 0 : index
    %c0_3 = arith.constant 0 : index
    %4 = vector.load %arg4[%c0_2, %c0_3] : memref<128x128xf32, #tpu.memory_space<vmem>>, vector<128x128xf32>
    %cst = arith.constant dense<0.000000e+00> : vector<8x128xf32>
    %5 = tpu.matmul %3, %4, %cst {dimension_numbers = #tpu.dot_dimension_numbers<[1], [0], [0], [1], [0, 0, 1, 1], [], []>} : vector<8x128xf32>, vector<128x128xf32>, vector<8x128xf32> -> vector<8x128xf32>
    %c0_4 = arith.constant 0 : index
    %c0_5 = arith.constant 0 : index
    %6 = vector.load %arg5[%c0_4, %c0_5] : memref<1x128xf32, #tpu.memory_space<vmem>>, vector<1x128xf32>
    %7 = vector.broadcast %6 : vector<1x128xf32> to vector<8x128xf32>
    %8 = arith.addf %5, %7 : vector<8x128xf32>
    %c0_6 = arith.constant 0 : index
    %c0_7 = arith.constant 0 : index
    %9 = vector.load %arg6[%c0_6, %c0_7] : memref<8x128xf32, #tpu.memory_space<vmem>>, vector<8x128xf32>
    tpu.vector_store %arg6[%c0_6, %c0_7], %8 {strides = array<i32>} : memref<8x128xf32, #tpu.memory_space<vmem>>, vector<8x128xf32>,
    return
  }
  func.func @transform_0(%arg0: i32, %arg1: i32) -> (i32, i32) {
    %c0_i32 = arith.constant 0 : i32
    %c0_i32_0 = arith.constant 0 : i32
    return %arg0, %c0_i32 : i32, i32
  }
  func.func @transform_1(%arg0: i32, %arg1: i32) -> (i32, i32) {
    %c0_i32 = arith.constant 0 : i32
    %c0_i32_0 = arith.constant 0 : i32
    %c0_i32_1 = arith.constant 0 : i32
    return %c0_i32, %c0_i32_0 : i32, i32
  }
  func.func @transform_2(%arg0: i32, %arg1: i32) -> (i32, i32) {
    %c0_i32 = arith.constant 0 : i32
    %c0_i32_0 = arith.constant 0 : i32
    return %c0_i32, %arg1 : i32, i32
  }
  func.func @transform_3(%arg0: i32, %arg1: i32) -> (i32, i32) {
    %c0_i32 = arith.constant 0 : i32
    %c0_i32_0 = arith.constant 0 : i32
    return %c0_i32, %arg1 : i32, i32
  }
  func.func @transform_4(%arg0: i32, %arg1: i32) -> (i32, i32) {
    %c0_i32 = arith.constant 0 : i32
    return %arg0, %arg1 : i32, i32
  }
}

</mosaic_0001>

<bundles_post_ra>
// kernel: tpu_custom_call.1
= control target key start
LH: loop header
LB: loop body
LE: loop exit
PB: predicated region body
PF: predicated region fallthrough
CT: control target
= control target key end

     0   :  { %9 = vsyncpa [#allocation4], 0  ;;  %s623_s0 = inlined_call_operand.hbm [shape: f32[8,128], index: 0, kind: input, shape index: {}]   ;;  %s624_s1 = inlined_call_operand.hbm [shape: f32[128,128], index: 1, kind: input, shape index: {}]   ;;  %s625_s2 = inlined_call_operand.hbm [shape: f32[128,128], index: 2, kind: input, shape index: {}]   ;;  %s626_s3 = inlined_call_operand.vmem [shape: f32[1,128], index: 3, kind: input, shape index: {}]   ;;  %s627_s4 = inlined_call_operand.hbm [shape: f32[8,128], index: 4, kind: output, shape index: {}]  }
   0x1   :  { %10 = vsyncpa [#allocation7], 0 }
   0x2   :  { %11 = vsyncpa [#allocation5], 0  ;;  %s516_s15 = smov [#allocation6]   ;;  %s422_s19 = scalar_lea.hbm %s624_s1, 2048 }
   0x3   :  { %s27_s16 = sshll.u32 %s516_s15, 4  ;;  %p423_p0 = scmp.ne.s32.totalorder %s624_s1, %s422_s19  ;;  %s28_s16 = int_to_ptr.vmem [resolvable:$true] %s27_s16 }
   0x4   :  { %p426_p1 = scmp.lt.u32.totalorder %s422_s19, %s624_s1 }
   0x6   :  { %p428_p2 = pnand %p426_p1, %p423_p0 }
   0x8   :  { %431 = shalt.err (!%p428_p2)
}
   0x9   :  { %s432_s24 = scalar_lea.vmem %s28_s16, 2048  ;;  %p437_p4 = scmp.lt.s32.totalorder %s28_s16, %s28_s16 }
   0xa   :  { %p433_p3 = scmp.ne.s32.totalorder %s28_s16, %s432_s24  ;;  %p438_p5 = scmp.lt.s32.totalorder %s432_s24, %s432_s24 }
   0xc   :  { %p439_p6 = por %p438_p5, %p437_p4 }
   0xe   :  { %p440_p7 = pnand %p439_p6, %p433_p3 }
  0x10   :  { %443 = shalt.err (!%p440_p7)
}
  0x11   :  { %s517_s25 = smov 128   ;;  %s518_s26 = smov 8  }
  0x12   :  { %33 = dma.hbm_to_vmem [thread:$0]  %s624_s1, 2048, %s28_s16, [#allocation7], %s517_s25, %s517_s25, %s518_s26  }
  0x13   :  { %s519_s29 = smov [#allocation3]   ;;  %s520_s5 = smov [#allocation8]  }
  0x14   :  { %s18_s30 = sshll.u32 %s519_s29, 4  ;;  %s39_s6 = sshll.u32 %s520_s5, 4  ;;  %s19_s30 = int_to_ptr.vmem [resolvable:$true] %s18_s30  ;;  %s40_s6 = int_to_ptr.vmem [resolvable:$true] %s39_s6 }
  0x15   :  { %s444_s9 = scalar_lea.hbm %s623_s0, 128 }
  0x16   :  { %p445_p8 = scmp.ne.s32.totalorder %s623_s0, %s444_s9  ;;  %p448_p9 = scmp.lt.u32.totalorder %s444_s9, %s623_s0 }
  0x18   :  { %p450_p10 = pnand %p448_p9, %p445_p8 }
  0x1a   :  { %453 = shalt.err (!%p450_p10)
}
  0x1b   :  { %s454_s1 = scalar_lea.vmem %s19_s30, 128  ;;  %p459_p12 = scmp.lt.s32.totalorder %s19_s30, %s19_s30 }
  0x1c   :  { %p455_p11 = scmp.ne.s32.totalorder %s19_s30, %s454_s1  ;;  %p460_p13 = scmp.lt.s32.totalorder %s454_s1, %s454_s1 }
  0x1e   :  { %p461_p0 = por %p460_p13, %p459_p12 }
  0x20   :  { %p462_p1 = pnand %p461_p0, %p455_p11 }
  0x22   :  { %465 = shalt.err (!%p462_p1)
}
  0x23   :  { %21 = dma.hbm_to_vmem [thread:$0]  %s623_s0, 128, %s19_s30, [#allocation4]  }
  0x24   :  { %s466_s18 = scalar_lea.hbm %s625_s2, 2048 }
  0x25   :  { %p467_p2 = scmp.ne.s32.totalorder %s625_s2, %s466_s18  ;;  %p470_p3 = scmp.lt.u32.totalorder %s466_s18, %s625_s2 }
  0x27   :  { %p472_p4 = pnand %p470_p3, %p467_p2 }
  0x29   :  { %475 = shalt.err (!%p472_p4)
}
  0x2a   :  { %s476_s23 = scalar_lea.vmem %s40_s6, 2048  ;;  %p481_p6 = scmp.lt.s32.totalorder %s40_s6, %s40_s6 }
  0x2b   :  { %p477_p5 = scmp.ne.s32.totalorder %s40_s6, %s476_s23  ;;  %p482_p7 = scmp.lt.s32.totalorder %s476_s23, %s476_s23 }
  0x2d   :  { %p483_p8 = por %p482_p7, %p481_p6 }
  0x2f   :  { %p484_p9 = pnand %p483_p8, %p477_p5 }
  0x31   :  { %487 = shalt.err (!%p484_p9)
}
  0x32   :  { %45 = dma.hbm_to_vmem [thread:$0]  %s625_s2, 2048, %s40_s6, [#allocation7], %s517_s25, %s517_s25, %s518_s26  }
  0x33   :  { %510 = dma.done.wait [#allocation4], 128  }
  0x34   :  { %511 = vsyncadd [#allocation4], 4294967168 }
  0x35   :  { %512 = dma.done.wait [#allocation7], 4096  }
  0x36   :  { %513 = vsyncadd [#allocation7], 4294963200  ;;  %v521_v0 = vmov 0.0|0.0   ;;  %vm522_vm0 = vmmov 0   ;;  %v523_v1 = vmov 0.0   ;;  %v62_v2 = vld [vmem:[#allocation6] sm:$0xff] }
  0x37   :  { %365 = vmatprep.subr.bf16.mxu0 %v521_v0  ;;  %327 = vmatprep.mubr.msk.f32.mxu0 %vm522_vm0, %v523_v1  ;;  %v63_v3 = vld [vmem:[#allocation6 + $0x8] sm:$0xff]  ;;  %v64_v4 = vld [vmem:[#allocation6 + $0x10] sm:$0xff]  ;;  %v65_v6 = vld [vmem:[#allocation6 + $0x18] sm:$0xff]  ;;  %s524_s26 = smov [#allocation9]  }
  0x38   :  { %389 = vmatprep.subr.bf16.mxu1 %v521_v0  ;;  %362 = vmatprep.mubr.msk.f32.mxu1 %vm522_vm0, %v523_v1  ;;  %v366_v5 = vpack.c.bf16 %v63_v3, %v62_v2  ;;  %v369_v7 = vpack.c.bf16 %v65_v6, %v64_v4  ;;  %v66_v8 = vld [vmem:[#allocation6 + $0x20] sm:$0xff]  ;;  %v67_v9 = vld [vmem:[#allocation6 + $0x28] sm:$0xff]  ;;  %v152_v12 = vld [vmem:[#allocation8 + $0x10] sm:$0xff]  ;;  %s250_s27 = sshll.u32 %s524_s26, 4  ;;  %s251_s27 = int_to_ptr.vmem [resolvable:$true] %s250_s27 }
  0x39   :  { %v150_v10 = vld [vmem:[#allocation8] sm:$0xff]  ;;  %v151_v11 = vld [vmem:[#allocation8 + $0x8] sm:$0xff]  ;;  %v153_v13 = vld [vmem:[#allocation8 + $0x18] sm:$0xff]  ;;  %v372_v14 = vpack.c.bf16 %v67_v9, %v66_v8  ;;  %s488_s28 = scalar_lea.vmem %s251_s27, 128  ;;  %p493_p11 = scmp.lt.s32.totalorder %s251_s27, %s251_s27 }
  0x3a   :  { %367 = vmatpush3.bf16.msra.mxu0 %v366_v5  ;;  %v390_v15 = vpack.c.bf16 %v151_v11, %v150_v10  ;;  %v68_v16 = vld [vmem:[#allocation6 + $0x30] sm:$0xff]  ;;  %v69_v17 = vld [vmem:[#allocation6 + $0x38] sm:$0xff]  ;;  %v393_v18 = vpack.c.bf16 %v153_v13, %v152_v12  ;;  %v154_v19 = vld [vmem:[#allocation8 + $0x20] sm:$0xff]  ;;  %p489_p10 = scmp.ne.s32.totalorder %s251_s27, %s488_s28  ;;  %p494_p12 = scmp.lt.s32.totalorder %s488_s28, %s488_s28 }
  0x3b   :  { %368 = vmatprep.subr.bf16.mxu0 %v521_v0  ;;  %v155_v20 = vld [vmem:[#allocation8 + $0x28] sm:$0xff]  ;;  %v375_v21 = vpack.c.bf16 %v69_v17, %v68_v16  ;;  %v70_v22 = vld [vmem:[#allocation6 + $0x40] sm:$0xff]  ;;  %v156_v25 = vld [vmem:[#allocation8 + $0x30] sm:$0xff] }
  0x3c   :  { %391 = vmatpush3.bf16.msra.mxu1 %v390_v15  ;;  %v71_v23 = vld [vmem:[#allocation6 + $0x48] sm:$0xff]  ;;  %v396_v24 = vpack.c.bf16 %v155_v20, %v154_v19  ;;  %v157_v26 = vld [vmem:[#allocation8 + $0x38] sm:$0xff]  ;;  %v72_v28 = vld [vmem:[#allocation6 + $0x50] sm:$0xff]  ;;  %p495_p13 = por %p494_p12, %p493_p11 }
  0x3d   :  { %392 = vmatprep.subr.bf16.mxu1 %v521_v0  ;;  %v378_v27 = vpack.c.bf16 %v71_v23, %v70_v22  ;;  %v73_v29 = vld [vmem:[#allocation6 + $0x58] sm:$0xff]  ;;  %v399_v30 = vpack.c.bf16 %v157_v26, %v156_v25  ;;  %v158_v31 = vld [vmem:[#allocation8 + $0x40] sm:$0xff]  ;;  %v159_v32 = vld [vmem:[#allocation8 + $0x48] sm:$0xff] }
  0x3e   :  { %370 = vmatpush3.bf16.msra.mxu0 %v369_v7  ;;  %v381_v33 = vpack.c.bf16 %v73_v29, %v72_v28  ;;  %v74_v34 = vld [vmem:[#allocation6 + $0x60] sm:$0xff]  ;;  %v75_v35 = vld [vmem:[#allocation6 + $0x68] sm:$0xff]  ;;  %v402_v36 = vpack.c.bf16 %v159_v32, %v158_v31  ;;  %v160_v37 = vld [vmem:[#allocation8 + $0x50] sm:$0xff]  ;;  %p496_p0 = pnand %p495_p13, %p489_p10 }
  0x3f   :  { %371 = vmatprep.subr.bf16.mxu0 %v521_v0  ;;  %v161_v38 = vld [vmem:[#allocation8 + $0x58] sm:$0xff]  ;;  %v384_v39 = vpack.c.bf16 %v75_v35, %v74_v34  ;;  %v76_v40 = vld [vmem:[#allocation6 + $0x70] sm:$0xff]  ;;  %v162_v43 = vld [vmem:[#allocation8 + $0x60] sm:$0xff] }
  0x40   :  { %394 = vmatpush3.bf16.msra.mxu1 %v393_v18  ;;  %v77_v41 = vld [vmem:[#allocation6 + $0x78] sm:$0xff]  ;;  %v405_v42 = vpack.c.bf16 %v161_v38, %v160_v37  ;;  %v163_v44 = vld [vmem:[#allocation8 + $0x68] sm:$0xff]  ;;  %v164_v47 = vld [vmem:[#allocation8 + $0x70] sm:$0xff] }
  0x41   :  { %395 = vmatprep.subr.bf16.mxu1 %v521_v0  ;;  %v387_v45 = vpack.c.bf16 %v77_v41, %v76_v40  ;;  %v408_v46 = vpack.c.bf16 %v163_v44, %v162_v43  ;;  %v165_v48 = vld [vmem:[#allocation8 + $0x78] sm:$0xff] }
  0x42   :  { %373 = vmatpush3.bf16.msra.mxu0 %v372_v14  ;;  %v61_v49 = vld [vmem:[#allocation3] sm:$0xff]  ;;  %v411_v50 = vpack.c.bf16 %v165_v48, %v164_v47 }
  0x43   :  { %374 = vmatprep.subr.bf16.mxu0 %v521_v0  ;;  %v260_v53 = vld [vmem:[%s626_s3] ss:$0 sm:$0xff] }
  0x44   :  { %397 = vmatpush3.bf16.msra.mxu1 %v396_v24 }
  0x45   :  { %398 = vmatprep.subr.bf16.mxu1 %v521_v0 }
  0x46   :  { %376 = vmatpush3.bf16.msra.mxu0 %v375_v21 }
  0x47   :  { %377 = vmatprep.subr.bf16.mxu0 %v521_v0 }
  0x48   :  { %400 = vmatpush3.bf16.msra.mxu1 %v399_v30 }
  0x49   :  { %401 = vmatprep.subr.bf16.mxu1 %v521_v0 }
  0x4a   :  { %379 = vmatpush3.bf16.msra.mxu0 %v378_v27 }
  0x4b   :  { %380 = vmatprep.subr.bf16.mxu0 %v521_v0 }
  0x4c   :  { %403 = vmatpush3.bf16.msra.mxu1 %v402_v36 }
  0x4d   :  { %404 = vmatprep.subr.bf16.mxu1 %v521_v0 }
  0x4e   :  { %382 = vmatpush3.bf16.msra.mxu0 %v381_v33 }
  0x4f   :  { %383 = vmatprep.subr.bf16.mxu0 %v521_v0 }
  0x50   :  { %406 = vmatpush3.bf16.msra.mxu1 %v405_v42 }
  0x51   :  { %407 = vmatprep.subr.bf16.mxu1 %v521_v0 }
  0x52   :  { %385 = vmatpush3.bf16.msra.mxu0 %v384_v39 }
  0x53   :  { %386 = vmatprep.subr.bf16.mxu0 %v521_v0 }
  0x54   :  { %409 = vmatpush3.bf16.msra.mxu1 %v408_v46 }
  0x55   :  { %410 = vmatprep.subr.bf16.mxu1 %v521_v0 }
  0x56   :  { %388 = vmatpush3.bf16.msra.mxu0 %v387_v45 }
  0x58   :  { %412 = vmatpush3.bf16.msra.mxu1 %v411_v50 }
  0x59   :  { %328 = vmatmul.mubr.f32.vlgmr.msra.gmra.mrb[0].mxu0 %v61_v49 }
 0x12c   :  { %v144_v51 = vpop.f32.mrb[0].mxu0 }
 0x12d   :  { %v329_v52 = vpop.f32.mrb[1].mxu0  ;;  %363 = vmatmul.mubr.f32.vlgmr.msra.gmra.mrb[0].mxu1 %v144_v51 }
 0x200   :  { %v239_v54 = vpop.f32.mrb[0].mxu1 }
 0x201   :  { %v240_v55 = vadd.f32 %v260_v53, %v239_v54  ;;  %v364_v56 = vpop.f32.mrb[1].mxu1 }
 0x203   :  { %243 = vst [vmem:[#allocation9] sm:$0xff] %v240_v55 }
 0x204   :  { %499 = shalt.err (!%p496_p0)
}
 0x205   :  { %s500_s5 = scalar_lea.hbm %s627_s4, 128 }
 0x206   :  { %p501_p1 = scmp.ne.s32.totalorder %s627_s4, %s500_s5  ;;  %p504_p2 = scmp.lt.u32.totalorder %s500_s5, %s627_s4 }
 0x208   :  { %p506_p3 = pnand %p504_p2, %p501_p1 }
 0x20a   :  { %509 = shalt.err (!%p506_p3)
}
 0x20b   :  { %253 = dma.vmem_to_hbm [thread:$0]  %s251_s27, 128, %s627_s4, [#allocation5]  }
 0x20c   :  { %514 = dma.done.wait [#allocation5], 128  }
 0x20d   :  { %515 = vsyncadd [#allocation5], 4294967168 }
 0x20e   :  { %257 = vsyncpa [#allocation4], 1 }
 0x20f   :  { %258 = vsyncpa [#allocation7], 1 }
 0x210   :  { %259 = vsyncpa [#allocation5], 1 }

</bundles_post_ra>
